<compile_context>
chip_gen: v7x
topology: tpu7x:2x2x1
jax: 0.10.0
libtpu: 0.0.40
codegen_flags: <defaults>
</compile_context>

<pallas_src>
import functools

import jax
import jax.numpy as jnp
from jax.experimental import pallas as pl
from jax.experimental.pallas import tpu as pltpu


def _round_up(x, m):
    return ((x + m - 1) // m) * m


def _actor_kernel(s_ref, w1_ref, b1_ref, w2_ref, b2_ref, w3_ref, b3_ref,
                  o_ref, *, max_action):
    # layer 1: (TB, S)bf16 @ (S, H)bf16 -> f32 acc, + bias, relu
    a = jnp.dot(s_ref[...], w1_ref[...], preferred_element_type=jnp.float32)
    a = jnp.maximum(a + b1_ref[...], 0.0)
    # layer 2: (TB, H)bf16 @ (H, H)bf16 -> f32 acc, + bias, relu
    a = jnp.dot(a.astype(jnp.bfloat16), w2_ref[...],
                preferred_element_type=jnp.float32)
    a = jnp.maximum(a + b2_ref[...], 0.0)
    # layer 3: (TB, H)bf16 @ (H, A)bf16 -> f32 acc, + bias, max_action*tanh
    a = jnp.dot(a.astype(jnp.bfloat16), w3_ref[...],
                preferred_element_type=jnp.float32)
    o_ref[...] = (max_action * jnp.tanh(a + b3_ref[...])).astype(o_ref.dtype)


def actor_forward(state, params, max_action, *, tile_b=512):
    """Fused Actor forward pass.

    state:  (B, state_dim) float32
    params: dict with w1 (S,256), b1 (1,256), w2 (256,256), b2 (1,256),
            w3 (256,A), b3 (1,A)   -- weights are (in, out) layout.
    """
    w1, b1 = params["w1"], params["b1"]
    w2, b2 = params["w2"], params["b2"]
    w3, b3 = params["w3"], params["b3"]
    B, S = state.shape
    H = w1.shape[1]
    A = w3.shape[1]

    # Batch tile: multiple of 8 (sublane), capped so it fits comfortably in
    # v7x's 64 MiB VMEM (double-buffered state/out blocks + resident weights
    # + per-tile activations stay well under the default scoped limit).
    TB = min(int(tile_b), _round_up(B, 8))
    TB = _round_up(TB, 8)
    B_pad = _round_up(B, TB)
    if B_pad != B:
        state = jnp.pad(state, ((0, B_pad - B), (0, 0)))

    # MXU-native operand dtype; accumulation stays f32 inside the kernel.
    s_bf = state.astype(jnp.bfloat16)
    w1b = w1.astype(jnp.bfloat16)
    w2b = w2.astype(jnp.bfloat16)
    w3b = w3.astype(jnp.bfloat16)

    n_tiles = B_pad // TB

    resident = lambda arr: pl.BlockSpec(arr.shape, lambda i: (0,) * arr.ndim)

    kernel = functools.partial(_actor_kernel, max_action=float(max_action))

    flops = 2 * B_pad * (S * H + H * H + H * A)
    bytes_accessed = (s_bf.size * 2 + (w1b.size + w2b.size + w3b.size) * 2
                      + (b1.size + b2.size + b3.size) * 4 + B_pad * A * 4)

    out = pl.pallas_call(
        kernel,
        out_shape=jax.ShapeDtypeStruct((B_pad, A), jnp.float32),
        grid=(n_tiles,),
        in_specs=[
            pl.BlockSpec((TB, S), lambda i: (i, 0)),   # state: tiled over batch
            resident(w1b), resident(b1),               # weights/biases: resident
            resident(w2b), resident(b2),
            resident(w3b), resident(b3),
        ],
        out_specs=pl.BlockSpec((TB, A), lambda i: (i, 0)),
        compiler_params=pltpu.CompilerParams(
            dimension_semantics=("parallel",)),
        cost_estimate=pl.CostEstimate(
            flops=flops,
            transcendentals=B_pad * A,
            bytes_accessed=bytes_accessed),
    )(s_bf, w1b, b1, w2b, b2, w3b, b3)

    return out[:B]


def init_actor_params(key, state_dim, action_dim, hidden=256):
    """Deterministic init mimicking PyTorch Linear default U[-1/sqrt(fan_in), +...]."""
    ks = jax.random.split(key, 6)

    def lin(kw, kb, fan_in, fan_out):
        bound = 1.0 / jnp.sqrt(jnp.float32(fan_in))
        w = jax.random.uniform(kw, (fan_in, fan_out), jnp.float32, -bound, bound)
        b = jax.random.uniform(kb, (1, fan_out), jnp.float32, -bound, bound)
        return w, b

    w1, b1 = lin(ks[0], ks[1], state_dim, hidden)
    w2, b2 = lin(ks[2], ks[3], hidden, hidden)
    w3, b3 = lin(ks[4], ks[5], hidden, action_dim)
    return {"w1": w1, "b1": b1, "w2": w2, "b2": b2, "w3": w3, "b3": b3}


def actor_reference(state, params, max_action):
    a = jnp.maximum(state @ params["w1"] + params["b1"], 0.0)
    a = jnp.maximum(a @ params["w2"] + params["b2"], 0.0)
    return max_action * jnp.tanh(a @ params["w3"] + params["b3"])


if __name__ == "__main__":
    key = jax.random.PRNGKey(0)
    k_params, k_state = jax.random.split(key)

    batch = 4
    state_dim = 16
    action_dim = 4
    max_action = 2.0

    params = init_actor_params(k_params, state_dim, action_dim)
    state = jax.random.normal(k_state, (batch, state_dim), jnp.float32)

    out = actor_forward(state, params, max_action)
    out = jax.block_until_ready(out)

    ref = actor_reference(state, params, max_action)
    assert out.shape == (batch, action_dim)
    # bf16 MXU operands with f32 accumulation -> relaxed tolerance vs f32 ref.
    assert jnp.allclose(out, ref, atol=2e-2, rtol=2e-2), "mismatch vs. reference"

    # Exercise batch padding + a multi-tile grid with a small tile size.
    state2 = jax.random.normal(jax.random.PRNGKey(1), (20, state_dim), jnp.float32)
    out2 = jax.block_until_ready(actor_forward(state2, params, max_action, tile_b=8))
    ref2 = actor_reference(state2, params, max_action)
    assert out2.shape == (20, action_dim)
    assert jnp.allclose(out2, ref2, atol=2e-2, rtol=2e-2), "mismatch vs. reference (tiled)"

    print("KERNEL_OK")
</pallas_src>

<mosaic_0001>
module attributes {stable_mosaic.version = 11 : i64} {
  func.func @_actor_kernel(%arg0: i32, %arg1: memref<8x16xbf16, #tpu.memory_space<vmem>>, %arg2: memref<16x256xbf16, #tpu.memory_space<vmem>>, %arg3: memref<1x256xf32, #tpu.memory_space<vmem>>, %arg4: memref<256x256xbf16, #tpu.memory_space<vmem>>, %arg5: memref<1x256xf32, #tpu.memory_space<vmem>>, %arg6: memref<256x4xbf16, #tpu.memory_space<vmem>>, %arg7: memref<1x4xf32, #tpu.memory_space<vmem>>, %arg8: memref<8x4xf32, #tpu.memory_space<vmem>>) attributes {dimension_semantics = [#tpu.dimension_semantics<parallel>], iteration_bounds = array<i64: 1>, scalar_prefetch = 0 : i64, scratch_operands = 0 : i64, tpu.core_type = #tpu.core_type<tc>, window_params = [{transform_indices = @transform_0, window_bounds = array<i64: 8, 16>}, {pipeline_mode = #tpu.pipeline_mode<synchronous>, transform_indices = @transform_1, window_bounds = array<i64: 16, 256>}, {pipeline_mode = #tpu.pipeline_mode<synchronous>, transform_indices = @transform_2, window_bounds = array<i64: 1, 256>}, {pipeline_mode = #tpu.pipeline_mode<synchronous>, transform_indices = @transform_3, window_bounds = array<i64: 256, 256>}, {pipeline_mode = #tpu.pipeline_mode<synchronous>, transform_indices = @transform_4, window_bounds = array<i64: 1, 256>}, {pipeline_mode = #tpu.pipeline_mode<synchronous>, transform_indices = @transform_5, window_bounds = array<i64: 256, 4>}, {pipeline_mode = #tpu.pipeline_mode<synchronous>, transform_indices = @transform_6, window_bounds = array<i64: 1, 4>}, {transform_indices = @transform_7, window_bounds = array<i64: 8, 4>}]} {
    %c0 = arith.constant 0 : index
    %c0_0 = arith.constant 0 : index
    %0 = vector.load %arg1[%c0, %c0_0] : memref<8x16xbf16, #tpu.memory_space<vmem>>, vector<8x16xbf16>
    %c0_1 = arith.constant 0 : index
    %c0_2 = arith.constant 0 : index
    %1 = vector.load %arg2[%c0_1, %c0_2] : memref<16x256xbf16, #tpu.memory_space<vmem>>, vector<16x256xbf16>
    %cst = arith.constant dense<0.000000e+00> : vector<8x256xf32>
    %2 = tpu.matmul %0, %1, %cst {dimension_numbers = #tpu.dot_dimension_numbers<[1], [0], [0], [1], [0, 0, 1, 1], [], []>} : vector<8x16xbf16>, vector<16x256xbf16>, vector<8x256xf32> -> vector<8x256xf32>
    %c0_3 = arith.constant 0 : index
    %c0_4 = arith.constant 0 : index
    %3 = vector.load %arg3[%c0_3, %c0_4] : memref<1x256xf32, #tpu.memory_space<vmem>>, vector<1x256xf32>
    %4 = vector.broadcast %3 : vector<1x256xf32> to vector<8x256xf32>
    %5 = arith.addf %2, %4 : vector<8x256xf32>
    %cst_5 = arith.constant 0.000000e+00 : f32
    %6 = vector.broadcast %cst_5 : f32 to vector<8x256xf32>
    %7 = arith.maximumf %5, %6 : vector<8x256xf32>
    %8 = arith.truncf %7 : vector<8x256xf32> to vector<8x256xbf16>
    %c0_6 = arith.constant 0 : index
    %c0_7 = arith.constant 0 : index
    %9 = vector.load %arg4[%c0_6, %c0_7] : memref<256x256xbf16, #tpu.memory_space<vmem>>, vector<256x256xbf16>
    %cst_8 = arith.constant dense<0.000000e+00> : vector<8x256xf32>
    %10 = tpu.matmul %8, %9, %cst_8 {dimension_numbers = #tpu.dot_dimension_numbers<[1], [0], [0], [1], [0, 0, 1, 1], [], []>} : vector<8x256xbf16>, vector<256x256xbf16>, vector<8x256xf32> -> vector<8x256xf32>
    %c0_9 = arith.constant 0 : index
    %c0_10 = arith.constant 0 : index
    %11 = vector.load %arg5[%c0_9, %c0_10] : memref<1x256xf32, #tpu.memory_space<vmem>>, vector<1x256xf32>
    %12 = vector.broadcast %11 : vector<1x256xf32> to vector<8x256xf32>
    %13 = arith.addf %10, %12 : vector<8x256xf32>
    %cst_11 = arith.constant 0.000000e+00 : f32
    %14 = vector.broadcast %cst_11 : f32 to vector<8x256xf32>
    %15 = arith.maximumf %13, %14 : vector<8x256xf32>
    %16 = arith.truncf %15 : vector<8x256xf32> to vector<8x256xbf16>
    %c0_12 = arith.constant 0 : index
    %c0_13 = arith.constant 0 : index
    %17 = vector.load %arg6[%c0_12, %c0_13] : memref<256x4xbf16, #tpu.memory_space<vmem>>, vector<256x4xbf16>
    %cst_14 = arith.constant dense<0.000000e+00> : vector<8x4xf32>
    %18 = tpu.matmul %16, %17, %cst_14 {dimension_numbers = #tpu.dot_dimension_numbers<[1], [0], [0], [1], [0, 0, 1, 1], [], []>} : vector<8x256xbf16>, vector<256x4xbf16>, vector<8x4xf32> -> vector<8x4xf32>
    %c0_15 = arith.constant 0 : index
    %c0_16 = arith.constant 0 : index
    %19 = vector.load %arg7[%c0_15, %c0_16] : memref<1x4xf32, #tpu.memory_space<vmem>>, vector<1x4xf32>
    %20 = vector.broadcast %19 : vector<1x4xf32> to vector<8x4xf32>
    %21 = arith.addf %18, %20 : vector<8x4xf32>
    %22 = math.tanh %21 : vector<8x4xf32>
    %cst_17 = arith.constant 2.000000e+00 : f32
    %23 = vector.broadcast %cst_17 : f32 to vector<8x4xf32>
    %24 = arith.mulf %23, %22 : vector<8x4xf32>
    %c0_18 = arith.constant 0 : index
    %c0_19 = arith.constant 0 : index
    %25 = vector.load %arg8[%c0_18, %c0_19] : memref<8x4xf32, #tpu.memory_space<vmem>>, vector<8x4xf32>
    tpu.vector_store %arg8[%c0_18, %c0_19], %24 {strides = array<i32>} : memref<8x4xf32, #tpu.memory_space<vmem>>, vector<8x4xf32>,
    return
  }
  func.func @transform_0(%arg0: i32) -> (i32, i32) {
    %c0_i32 = arith.constant 0 : i32
    %c0_i32_0 = arith.constant 0 : i32
    return %arg0, %c0_i32 : i32, i32
  }
  func.func @transform_1(%arg0: i32) -> (i32, i32) {
    %c0_i32 = arith.constant 0 : i32
    %c0_i32_0 = arith.constant 0 : i32
    %c0_i32_1 = arith.constant 0 : i32
    return %c0_i32, %c0_i32_0 : i32, i32
  }
  func.func @transform_2(%arg0: i32) -> (i32, i32) {
    %c0_i32 = arith.constant 0 : i32
    %c0_i32_0 = arith.constant 0 : i32
    %c0_i32_1 = arith.constant 0 : i32
    return %c0_i32, %c0_i32_0 : i32, i32
  }
  func.func @transform_3(%arg0: i32) -> (i32, i32) {
    %c0_i32 = arith.constant 0 : i32
    %c0_i32_0 = arith.constant 0 : i32
    %c0_i32_1 = arith.constant 0 : i32
    return %c0_i32, %c0_i32_0 : i32, i32
  }
  func.func @transform_4(%arg0: i32) -> (i32, i32) {
    %c0_i32 = arith.constant 0 : i32
    %c0_i32_0 = arith.constant 0 : i32
    %c0_i32_1 = arith.constant 0 : i32
    return %c0_i32, %c0_i32_0 : i32, i32
  }
  func.func @transform_5(%arg0: i32) -> (i32, i32) {
    %c0_i32 = arith.constant 0 : i32
    %c0_i32_0 = arith.constant 0 : i32
    %c0_i32_1 = arith.constant 0 : i32
    return %c0_i32, %c0_i32_0 : i32, i32
  }
  func.func @transform_6(%arg0: i32) -> (i32, i32) {
    %c0_i32 = arith.constant 0 : i32
    %c0_i32_0 = arith.constant 0 : i32
    %c0_i32_1 = arith.constant 0 : i32
    return %c0_i32, %c0_i32_0 : i32, i32
  }
  func.func @transform_7(%arg0: i32) -> (i32, i32) {
    %c0_i32 = arith.constant 0 : i32
    %c0_i32_0 = arith.constant 0 : i32
    return %arg0, %c0_i32 : i32, i32
  }
}

</mosaic_0001>

<bundles_post_ra>
// kernel: tpu_custom_call.1
= control target key start
LH: loop header
LB: loop body
LE: loop exit
PB: predicated region body
PF: predicated region fallthrough
CT: control target
= control target key end

     0   :  { %12 = vsyncpa [#allocation3], 0  ;;  %s719_s24 = smov [#allocation2]   ;;  %s844_s0 = inlined_call_operand.vmem [shape: bf16[8,16], index: 0, kind: input, shape index: {}]   ;;  %s845_s1 = inlined_call_operand.vmem [shape: bf16[16,256], index: 1, kind: input, shape index: {}]   ;;  %s846_s2 = inlined_call_operand.vmem [shape: f32[1,256], index: 2, kind: input, shape index: {}]   ;;  %s847_s3 = inlined_call_operand.hbm [shape: bf16[256,256], index: 3, kind: input, shape index: {}]   ;;  %s848_s4 = inlined_call_operand.vmem [shape: f32[1,256], index: 4, kind: input, shape index: {}]   ;;  %s849_s5 = inlined_call_operand.vmem [shape: bf16[256,4], index: 5, kind: input, shape index: {}]   ;;  %s850_s6 = inlined_call_operand.vmem [shape: f32[1,4], index: 6, kind: input, shape index: {}]   ;;  %s851_s7 = inlined_call_operand.vmem [shape: f32[8,4], index: 7, kind: output, shape index: {}]  }
   0x1   :  { %s24_s25 = sshll.u32 %s719_s24, 4  ;;  %s695_s28 = scalar_lea.hbm %s847_s3, 4096  ;;  %s25_s25 = int_to_ptr.vmem [resolvable:$true] %s24_s25 }
   0x2   :  { %p696_p0 = scmp.ne.s32.totalorder %s847_s3, %s695_s28  ;;  %p699_p1 = scmp.lt.u32.totalorder %s695_s28, %s847_s3 }
   0x4   :  { %p701_p2 = pnand %p699_p1, %p696_p0 }
   0x6   :  { %704 = shalt.err (!%p701_p2)
}
   0x7   :  { %s705_s10 = scalar_lea.vmem %s25_s25, 4096  ;;  %p710_p4 = scmp.lt.s32.totalorder %s25_s25, %s25_s25 }
   0x8   :  { %p706_p3 = scmp.ne.s32.totalorder %s25_s25, %s705_s10  ;;  %p711_p5 = scmp.lt.s32.totalorder %s705_s10, %s705_s10 }
   0xa   :  { %p712_p6 = por %p711_p5, %p710_p4 }
   0xc   :  { %p713_p7 = pnand %p712_p6, %p706_p3 }
   0xe   :  { %716 = shalt.err (!%p713_p7)
}
   0xf   :  { %s720_s11 = smov 128   ;;  %s721_s12 = smov 8  }
  0x10   :  { %30 = dma.hbm_to_vmem [thread:$0]  %s847_s3, 4096, %s25_s25, [#allocation3], %s720_s11, %s720_s11, %s721_s12  }
  0x11   :  { %717 = dma.done.wait [#allocation3], 4096  }
  0x12   :  { %718 = vsyncadd [#allocation3], 4294963200  ;;  %v722_v0 = vmov 0   ;;  %v626_v1 = vld [vmem:[%s845_s1 + $0x4] ss:$8 sps:$4 sm:$0xff]   ;;  %vm66_vm0 = vcmask 130048   ;;  %v46_v48 = vlaneseq }
  0x13   :  { %102 = vmatprep.mubr.bf16.mxu0 %v722_v0  ;;  %v628_v2 = vld [vmem:[%s845_s1] ss:$8 sps:$4 sm:$0xff]   ;;  %70 = vmatprep.subr.bf16.mxu0 %v626_v1  ;;  %v629_v4 = vld [vmem:[#allocation2 + $0x4] ss:$8 sps:$4 sm:$0xff]   ;;  %v632_v6 = vld [vmem:[#allocation2 + $0x14] ss:$8 sps:$4 sm:$0xff]  }
  0x14   :  { %v41_v3 = vld [vmem:[%s844_s0] sm:$0xf]  ;;  %71 = vmatpush1.bf16.msra.mxu0 %v628_v2  ;;  %319 = vmatprep.subr.bf16.mxu1 %v629_v4  ;;  %v634_v7 = vld [vmem:[#allocation2 + $0x10] ss:$8 sps:$4 sm:$0xff]   ;;  %v635_v8 = vld [vmem:[#allocation2 + $0x24] ss:$8 sps:$4 sm:$0xff]  }
  0x15   :  { %v631_v5 = vld [vmem:[#allocation2] ss:$8 sps:$4 sm:$0xff]   ;;  %v638_v10 = vld [vmem:[#allocation2 + $0x34] ss:$8 sps:$4 sm:$0xff]   ;;  %v640_v11 = vld [vmem:[#allocation2 + $0x30] ss:$8 sps:$4 sm:$0xff]  }
  0x16   :  { %320 = vmatpush1.bf16.msra.mxu1 %v631_v5  ;;  %v637_v9 = vld [vmem:[#allocation2 + $0x20] ss:$8 sps:$4 sm:$0xff]   ;;  %v641_v12 = vld [vmem:[#allocation2 + $0x44] ss:$8 sps:$4 sm:$0xff]   ;;  %v644_v14 = vld [vmem:[#allocation2 + $0x54] ss:$8 sps:$4 sm:$0xff]  }
  0x17   :  { %550 = vmatmul.mubr.msk.bf16.vlgmr.msra.gmra.mrb[0].mxu0 %vm66_vm0, %v41_v3  ;;  %321 = vmatprep.subr.bf16.mxu1 %v632_v6  ;;  %v643_v13 = vld [vmem:[#allocation2 + $0x40] ss:$8 sps:$4 sm:$0xff]   ;;  %v646_v15 = vld [vmem:[#allocation2 + $0x50] ss:$8 sps:$4 sm:$0xff]   ;;  %v647_v16 = vld [vmem:[#allocation2 + $0x64] ss:$8 sps:$4 sm:$0xff]  }
  0x18   :  { %v649_v17 = vld [vmem:[#allocation2 + $0x60] ss:$8 sps:$4 sm:$0xff]   ;;  %v650_v18 = vld [vmem:[#allocation2 + $0x74] ss:$8 sps:$4 sm:$0xff]   ;;  %v652_v19 = vld [vmem:[#allocation2 + $0x70] ss:$8 sps:$4 sm:$0xff]  }
  0x19   :  { %v653_v20 = vld [vmem:[#allocation2 + $0x84] ss:$8 sps:$4 sm:$0xff]   ;;  %v655_v21 = vld [vmem:[#allocation2 + $0x80] ss:$8 sps:$4 sm:$0xff]   ;;  %v656_v22 = vld [vmem:[#allocation2 + $0x94] ss:$8 sps:$4 sm:$0xff]  }
  0x1a   :  { %322 = vmatpush1.bf16.msra.mxu1 %v634_v7  ;;  %v658_v23 = vld [vmem:[#allocation2 + $0x90] ss:$8 sps:$4 sm:$0xff]   ;;  %v659_v24 = vld [vmem:[#allocation2 + $0xa4] ss:$8 sps:$4 sm:$0xff]   ;;  %v661_v25 = vld [vmem:[#allocation2 + $0xa0] ss:$8 sps:$4 sm:$0xff]  }
  0x1b   :  { %323 = vmatprep.subr.bf16.mxu1 %v635_v8  ;;  %v662_v26 = vld [vmem:[#allocation2 + $0xb4] ss:$8 sps:$4 sm:$0xff]   ;;  %v664_v27 = vld [vmem:[#allocation2 + $0xb0] ss:$8 sps:$4 sm:$0xff]   ;;  %v665_v28 = vld [vmem:[#allocation2 + $0xc4] ss:$8 sps:$4 sm:$0xff]  }
  0x1c   :  { %v667_v29 = vld [vmem:[#allocation2 + $0xc0] ss:$8 sps:$4 sm:$0xff]   ;;  %v668_v30 = vld [vmem:[#allocation2 + $0xd4] ss:$8 sps:$4 sm:$0xff]   ;;  %v670_v31 = vld [vmem:[#allocation2 + $0xd0] ss:$8 sps:$4 sm:$0xff]  }
  0x1d   :  { %v671_v32 = vld [vmem:[#allocation2 + $0xe4] ss:$8 sps:$4 sm:$0xff]   ;;  %v673_v33 = vld [vmem:[#allocation2 + $0xe0] ss:$8 sps:$4 sm:$0xff]   ;;  %v674_v34 = vld [vmem:[#allocation2 + $0xf4] ss:$8 sps:$4 sm:$0xff]  }
  0x1e   :  { %324 = vmatpush1.bf16.msra.mxu1 %v637_v9  ;;  %v676_v35 = vld [vmem:[#allocation2 + $0xf0] ss:$8 sps:$4 sm:$0xff]   ;;  %v677_v36 = vld [vmem:[%s849_s5 + $0x40] sm:$0xff]   ;;  %v679_v38 = vld [vmem:[%s849_s5 + $0x48] sm:$0xff]   ;;  %v47_v49 = vshrl.u32 %v46_v48, 7  ;;  %vm541_vm1 = vcmask 31744  }
  0x1f   :  { %325 = vmatprep.subr.bf16.mxu1 %v638_v10  ;;  %v678_v37 = vld [vmem:[%s849_s5] sm:$0xff]   ;;  %600 = vmatprep.subr.bf16.mxu0 %v677_v36  ;;  %v680_v39 = vld [vmem:[%s849_s5 + $0x8] sm:$0xff]   ;;  %v681_v40 = vld [vmem:[%s849_s5 + $0x50] sm:$0xff]  }
  0x20   :  { %601 = vmatpush3.bf16.msra.mxu0 %v678_v37  ;;  %v682_v41 = vld [vmem:[%s849_s5 + $0x10] sm:$0xff]   ;;  %v683_v42 = vld [vmem:[%s849_s5 + $0x58] sm:$0xff]   ;;  %v685_v44 = vld [vmem:[%s849_s5 + $0x60] sm:$0xff]   ;;  %v48_v50 = vsub.s32 0, %v47_v49  ;;  %v52_v52 = vsub.s32 1, %v47_v49 }
  0x21   :  { %602 = vmatprep.subr.bf16.mxu0 %v679_v38  ;;  %v684_v43 = vld [vmem:[%s849_s5 + $0x18] sm:$0xff]   ;;  %v686_v45 = vld [vmem:[%s849_s5 + $0x20] sm:$0xff]   ;;  %v687_v46 = vld [vmem:[%s849_s5 + $0x68] sm:$0xff]  }
  0x22   :  { %326 = vmatpush1.bf16.msra.mxu1 %v640_v11  ;;  %v688_v47 = vld [vmem:[%s849_s5 + $0x28] sm:$0xff]   ;;  %v44_v51 = vld [vmem:[%s846_s2] sm:$0x3]  ;;  %v689_v1 = vld [vmem:[%s849_s5 + $0x70] sm:$0xff]  }
  0x23   :  { %327 = vmatprep.subr.bf16.mxu1 %v641_v12  ;;  %v49_v53 = vrot.slane %v44_v51, %v48_v50  ;;  %v53_v54 = vrot.slane %v44_v51, %v52_v52  ;;  %v690_v2 = vld [vmem:[%s849_s5 + $0x30] sm:$0xff]   ;;  %v691_v3 = vld [vmem:[%s849_s5 + $0x78] sm:$0xff]   ;;  %v147_v5 = vld [vmem:[%s848_s4] sm:$0x3] }
  0x24   :  { %603 = vmatpush3.bf16.msra.mxu0 %v680_v39  ;;  %v692_v4 = vld [vmem:[%s849_s5 + $0x38] sm:$0xff]   ;;  %v152_v6 = vrot.slane %v147_v5, %v48_v50  ;;  %v156_v7 = vrot.slane %v147_v5, %v52_v52 }
  0x25   :  { %604 = vmatprep.subr.bf16.mxu0 %v681_v40 }
  0x26   :  { %328 = vmatpush1.bf16.msra.mxu1 %v643_v13 }
  0x27   :  { %329 = vmatprep.subr.bf16.mxu1 %v644_v14 }
  0x28   :  { %605 = vmatpush3.bf16.msra.mxu0 %v682_v41 }
  0x29   :  { %606 = vmatprep.subr.bf16.mxu0 %v683_v42 }
  0x2a   :  { %330 = vmatpush1.bf16.msra.mxu1 %v646_v15 }
  0x2b   :  { %331 = vmatprep.subr.bf16.mxu1 %v647_v16 }
  0x2c   :  { %607 = vmatpush3.bf16.msra.mxu0 %v684_v43 }
  0x2d   :  { %608 = vmatprep.subr.bf16.mxu0 %v685_v44 }
  0x2e   :  { %332 = vmatpush1.bf16.msra.mxu1 %v649_v17 }
  0x2f   :  { %333 = vmatprep.subr.bf16.mxu1 %v650_v18 }
  0x30   :  { %609 = vmatpush3.bf16.msra.mxu0 %v686_v45 }
  0x31   :  { %610 = vmatprep.subr.bf16.mxu0 %v687_v46 }
  0x32   :  { %334 = vmatpush1.bf16.msra.mxu1 %v652_v19  ;;  %v583_v19 = vld [vmem:[%s850_s6] ss:$0 sm:$0xff] }
  0x33   :  { %335 = vmatprep.subr.bf16.mxu1 %v653_v20 }
  0x34   :  { %611 = vmatpush3.bf16.msra.mxu0 %v688_v47 }
  0x35   :  { %612 = vmatprep.subr.bf16.mxu0 %v689_v1 }
  0x36   :  { %336 = vmatpush1.bf16.msra.mxu1 %v655_v21 }
  0x37   :  { %337 = vmatprep.subr.bf16.mxu1 %v656_v22 }
  0x38   :  { %613 = vmatpush3.bf16.msra.mxu0 %v690_v2 }
  0x39   :  { %614 = vmatprep.subr.bf16.mxu0 %v691_v3 }
  0x3a   :  { %338 = vmatpush1.bf16.msra.mxu1 %v658_v23 }
  0x3b   :  { %339 = vmatprep.subr.bf16.mxu1 %v659_v24 }
  0x3c   :  { %615 = vmatpush3.bf16.msra.mxu0 %v692_v4 }
  0x3e   :  { %340 = vmatpush1.bf16.msra.mxu1 %v661_v25 }
  0x3f   :  { %341 = vmatprep.subr.bf16.mxu1 %v662_v26 }
  0x42   :  { %342 = vmatpush1.bf16.msra.mxu1 %v664_v27 }
  0x43   :  { %343 = vmatprep.subr.bf16.mxu1 %v665_v28 }
  0x46   :  { %344 = vmatpush1.bf16.msra.mxu1 %v667_v29 }
  0x47   :  { %345 = vmatprep.subr.bf16.mxu1 %v668_v30 }
  0x4a   :  { %346 = vmatpush1.bf16.msra.mxu1 %v670_v31 }
  0x4b   :  { %347 = vmatprep.subr.bf16.mxu1 %v671_v32 }
  0x4e   :  { %348 = vmatpush1.bf16.msra.mxu1 %v673_v33 }
  0x4f   :  { %349 = vmatprep.subr.bf16.mxu1 %v674_v34 }
  0x52   :  { %350 = vmatpush1.bf16.msra.mxu1 %v676_v35 }
  0xea   :  { %v104_v55 = vpop.f32.mrb[0].mxu0 }
  0xeb   :  { %v105_v56 = vadd.f32 %v104_v55, %v49_v53  ;;  %v106_v57 = vpop.f32.mrb[1].mxu0 }
  0xec   :  { %v107_v58 = vadd.f32 %v106_v57, %v53_v54  ;;  %v108_v59 = vpop.f32.mrb[2].mxu0 }
  0xed   :  { %v111_v60 = vmax.f32 %v105_v56, 0.0  ;;  %v109_v61 = vpop.f32.mrb[3].mxu0 }
  0xee   :  { %v112_v62 = vmax.f32 %v107_v58, 0.0 }
  0xef   :  { %v113_v0 = vpack.c.bf16 %v111_v60, %v111_v60 }
  0xf0   :  { %v114_v63 = vpack.c.bf16 %v112_v62, %v112_v62 }
  0xf2   :  { %351 = vmatprep.mubr.bf16.mxu1 %v114_v63 }
  0xf3   :  { %352 = vmatmul.mubr.bf16.vlgmr.msra.gmra.mrb[0].mxu1 %v113_v0 }
 0x1c6   :  { %v353_v8 = vpop.f32.mrb[0].mxu1 }
 0x1c7   :  { %v354_v9 = vadd.f32 %v353_v8, %v152_v6  ;;  %v355_v10 = vpop.f32.mrb[1].mxu1 }
 0x1c8   :  { %v356_v11 = vadd.f32 %v355_v10, %v156_v7  ;;  %v357_v12 = vpop.f32.mrb[2].mxu1 }
 0x1c9   :  { %v360_v13 = vmax.f32 %v354_v9, 0.0  ;;  %v358_v14 = vpop.f32.mrb[3].mxu1 }
 0x1ca   :  { %v361_v15 = vmax.f32 %v356_v11, 0.0 }
 0x1cb   :  { %v362_v17 = vpack.c.bf16 %v360_v13, %v360_v13 }
 0x1cc   :  { %v363_v16 = vpack.c.bf16 %v361_v15, %v361_v15 }
 0x1ce   :  { %531 = vmatprep.mubr.bf16.mxu0 %v363_v16 }
 0x1cf   :  { %532 = vmatmul.mubr.bf16.vlgmr.msra.gmra.mrb[4].mxu0 %v362_v17 }
 0x2a2   :  { %v616_v18 = vpop.f32.mrb[4].mxu0 }
 0x2a3   :  { %v617_v20 = vpop.f32.mrb[5].mxu0 }
 0x2a4   :  { %v618_v21 = vadd.f32 %v617_v20, %v616_v18  ;;  %v619_v22 = vpop.f32.mrb[6].mxu0 }
 0x2a5   :  { %v620_v23 = vpop.f32.mrb[7].mxu0 }
 0x2a6   :  { %v534_v24 = vadd.f32 %v618_v21, %v583_v19 }
 0x2a8   :  { %693 = vtanh.f32 %v534_v24 }
 0x2b2   :  { %v694_v25 = vpop.eup %693 }
 0x2b3   :  { %v540_v26 = vmul.f32 2.0, %v694_v25 }
 0x2b5   :  { %542 = vst.msk [vmem:[%s851_s7] sm:$0xff] %vm541_vm1, %v540_v26 }
 0x2b6   :  { %547 = vsyncpa [#allocation3], 1 }

</bundles_post_ra>
